<compile_context>
chip_gen: v6e
topology: v6e:2x2x1
jax: 0.10.0
libtpu: 0.0.40
codegen_flags: <defaults>
</compile_context>

<pallas_src>
import jax
import jax.numpy as jnp
from jax.experimental import pallas as pl
from jax.experimental.pallas import tpu as pltpu


def _round_up(x, m):
    return ((x + m - 1) // m) * m


# ---------------------------------------------------------------------------
# Kernel
# ---------------------------------------------------------------------------
def _make_fctqv_kernel(din_pad, h2, n_mid):
    """Fused twin-Q kernel for a fixed (static) packed-slab layout.

    w_ref rows:
      [0, din_pad)                    : layer-0 weights [din_pad, 2H] (zero rows pad)
      next n_mid * 2H rows            : block-diagonal hidden layers [2H, 2H]
    b_ref row i                       : bias of layer i, [1, 2H]
    wout_ref                          : [2H, 128]; only cols 0 (qa) / 1 (qb) real
    bout_ref                          : [1, 128];  only cols 0 / 1 real
    """

    def kernel(x_ref, w_ref, b_ref, wout_ref, bout_ref, q_ref):
        bf16 = jnp.bfloat16
        b = b_ref[...]  # [n_mid + 1, 2H], f32, tiny

        # ---- layer 0: single dot on the merged [state|action] tile (bf16 x bf16)
        w0 = w_ref[pl.ds(0, din_pad), :]
        h = jnp.dot(x_ref[...], w0, preferred_element_type=jnp.float32) + b[0:1, :]
        h = jnp.maximum(h, 0.0)

        # ---- fused (block-diagonal) hidden layers
        off = din_pad
        for i in range(n_mid):
            w_i = w_ref[pl.ds(off, h2), :]
            h = (
                jnp.dot(h.astype(bf16), w_i, preferred_element_type=jnp.float32)
                + b[i + 1 : i + 2, :]
            )
            h = jnp.maximum(h, 0.0)
            off += h2

        # ---- fused output layer, lane-dense (tm, 128) unmasked store
        q = (
            jnp.dot(h.astype(bf16), wout_ref[...], preferred_element_type=jnp.float32)
            + bout_ref[...]
        )
        q_ref[...] = q.astype(q_ref.dtype)

    return kernel


# ---------------------------------------------------------------------------
# Parameter packing (done once, outside the hot path)
# ---------------------------------------------------------------------------
def pack_fctqv_params(params, input_dim, output_dim, out_width=128):
    """Fuse the twin streams into packed bf16 weight slabs + f32 bias slabs.

    Returns (w_main, b_main, w_out, b_out, layout).
    Requires all hidden widths equal (matches the module default (32, 32)).
    """
    n_layers = 0
    while f"wa{n_layers}" in params:
        n_layers += 1
    assert n_layers >= 2, "need at least input layer + output layer"
    h = params["wa0"].shape[1]
    assert h % 8 == 0, "hidden width must be a multiple of 8"
    for i in range(1, n_layers - 1):
        assert params[f"wa{i}"].shape == (h, h), "equal hidden widths required"
    assert params[f"wa{n_layers - 1}"].shape == (h, 1)

    f32, bf16 = jnp.float32, jnp.bfloat16
    h2 = 2 * h                                # multiple of 16 -> bf16 sublane aligned
    din = input_dim + output_dim
    din_pad = _round_up(din, 16)              # 16-aligned so bf16 row slices are aligned
    n_mid = n_layers - 2

    # layer 0: [din, 2H] zero-padded to [din_pad, 2H]
    w0 = jnp.concatenate([params["wa0"], params["wb0"]], axis=1).astype(f32)
    w0p = jnp.zeros((din_pad, h2), f32).at[:din, :].set(w0)
    blocks = [w0p]
    biases = [jnp.concatenate([params["ba0"], params["bb0"]], axis=1).astype(f32)]

    # hidden layers: exact block-diagonal fusion of streams a / b
    for i in range(1, n_layers - 1):
        w_i = jnp.zeros((h2, h2), f32)
        w_i = w_i.at[:h, :h].set(params[f"wa{i}"]).at[h:, h:].set(params[f"wb{i}"])
        blocks.append(w_i)
        biases.append(
            jnp.concatenate([params[f"ba{i}"], params[f"bb{i}"]], axis=1).astype(f32)
        )

    w_main = jnp.concatenate(blocks, axis=0).astype(bf16)   # [din_pad + n_mid*2H, 2H]
    b_main = jnp.concatenate(biases, axis=0).astype(f32)    # [n_mid + 1, 2H]

    # output layer: [2H, 2] real -> zero-padded to [2H, out_width] for a
    # lane-dense output store; qa = col 0, qb = col 1.
    last = n_layers - 1
    w_out = jnp.zeros((h2, out_width), f32)
    w_out = w_out.at[:h, 0:1].set(params[f"wa{last}"]).at[h:, 1:2].set(params[f"wb{last}"])
    w_out = w_out.astype(bf16)
    b_out = jnp.zeros((1, out_width), f32)
    b_out = b_out.at[0, 0].set(params[f"ba{last}"][0, 0]).at[0, 1].set(params[f"bb{last}"][0, 0])

    layout = dict(
        input_dim=input_dim, output_dim=output_dim,
        din_pad=din_pad, h2=h2, n_mid=n_mid, out_width=out_width,
    )
    return w_main, b_main, w_out, b_out, layout


# ---------------------------------------------------------------------------
# Forward
# ---------------------------------------------------------------------------
def _pick_block_rows(B, max_tile=2048):
    """Large tiles (per-step overhead dominates this tiny MLP), but keep >= 2
    grid steps when the batch is big enough so v7x's 2 TensorCores both work."""
    rows8 = _round_up(max(B, 8), 8)
    if rows8 <= 16:
        return rows8
    return min(max_tile, _round_up((rows8 + 1) // 2, 8))


def fctqv_forward(state, action, w_main, b_main, w_out, b_out, layout, *, block_rows=None):
    """Twin Q forward. state: [B, input_dim], action: [B, output_dim].

    Returns (qa, qb), each [B, 1] float32.
    """
    B = state.shape[0]
    din_pad, h2, n_mid = layout["din_pad"], layout["h2"], layout["n_mid"]
    input_dim, output_dim = layout["input_dim"], layout["output_dim"]
    out_w = layout["out_width"]

    if block_rows is None:
        block_rows = _pick_block_rows(B)
    tm = block_rows
    b_pad = _round_up(B, tm)

    # merged, zero-padded [state|action] input in bf16 (padded lanes hit zero
    # weight rows; padded batch rows are sliced off after the call)
    x = jnp.zeros((b_pad, din_pad), jnp.bfloat16)
    x = x.at[:B, :input_dim].set(state.astype(jnp.bfloat16))
    x = x.at[:B, input_dim:input_dim + output_dim].set(action.astype(jnp.bfloat16))

    kernel = _make_fctqv_kernel(din_pad, h2, n_mid)

    q = pl.pallas_call(
        kernel,
        out_shape=jax.ShapeDtypeStruct((b_pad, out_w), jnp.float32),
        grid=(b_pad // tm,),
        in_specs=[
            pl.BlockSpec((tm, din_pad), lambda i: (i, 0)),             # batch tile
            pl.BlockSpec((w_main.shape[0], h2), lambda i: (0, 0)),     # weight slab (resident)
            pl.BlockSpec((b_main.shape[0], h2), lambda i: (0, 0)),     # bias slab (resident)
            pl.BlockSpec((h2, out_w), lambda i: (0, 0)),               # output weights (resident)
            pl.BlockSpec((1, out_w), lambda i: (0, 0)),                # output bias (resident)
        ],
        out_specs=pl.BlockSpec((tm, out_w), lambda i: (i, 0)),
        compiler_params=pltpu.CompilerParams(
            dimension_semantics=("parallel",)),
    )(x, w_main, b_main, w_out, b_out)

    q = q[:B]
    return q[:, 0:1], q[:, 1:2]


# ---------------------------------------------------------------------------
# Init + pure-JAX reference
# ---------------------------------------------------------------------------
def init_fctqv_params(key, input_dim, output_dim, hidden_dims=(32, 32)):
    """PyTorch nn.Linear default-style init: U[-1/sqrt(fan_in), 1/sqrt(fan_in)].

    Weights stored transposed: [in_features, out_features]; biases [1, out].
    """
    dims = [input_dim + output_dim] + list(hidden_dims) + [1]
    params = {}
    for wn, bn in (("wa", "ba"), ("wb", "bb")):
        for i in range(len(dims) - 1):
            fan_in, fan_out = dims[i], dims[i + 1]
            bound = 1.0 / jnp.sqrt(jnp.float32(fan_in))
            key, kw, kb = jax.random.split(key, 3)
            params[f"{wn}{i}"] = jax.random.uniform(
                kw, (fan_in, fan_out), jnp.float32, -bound, bound)
            params[f"{bn}{i}"] = jax.random.uniform(
                kb, (1, fan_out), jnp.float32, -bound, bound)
    return params


def fctqv_forward_ref(state, action, params):
    """Pure-JAX f32 reference matching the PyTorch module semantics."""
    x = jnp.concatenate([state, action], axis=1).astype(jnp.float32)
    xa = jax.nn.relu(x @ params["wa0"] + params["ba0"])
    xa = jax.nn.relu(xa @ params["wa1"] + params["ba1"])
    xa = xa @ params["wa2"] + params["ba2"]
    xb = jax.nn.relu(x @ params["wb0"] + params["bb0"])
    xb = jax.nn.relu(xb @ params["wb1"] + params["bb1"])
    xb = xb @ params["wb2"] + params["bb2"]
    return xa, xb


if __name__ == "__main__":
    input_dim = 8    # state dim
    output_dim = 2   # action dim
    hidden_dims = (32, 32)

    params = init_fctqv_params(jax.random.PRNGKey(0), input_dim, output_dim, hidden_dims)
    w_main, b_main, w_out, b_out, layout = pack_fctqv_params(params, input_dim, output_dim)

    # tolerance is loose because dot operands are bf16 (f32 accumulation)
    ATOL = RTOL = 5e-2

    # --- small single-tile case -------------------------------------------
    key = jax.random.PRNGKey(0)
    key, ks, ka = jax.random.split(key, 3)
    batch = 4
    state = jax.random.normal(ks, (batch, input_dim), jnp.float32)
    action = jax.random.normal(ka, (batch, output_dim), jnp.float32)

    qa, qb = fctqv_forward(state, action, w_main, b_main, w_out, b_out, layout)
    jax.block_until_ready((qa, qb))
    qa_ref, qb_ref = fctqv_forward_ref(state, action, params)
    assert qa.shape == (batch, 1) and qb.shape == (batch, 1)
    assert jnp.allclose(qa, qa_ref, atol=ATOL, rtol=RTOL), "stream A mismatch (small)"
    assert jnp.allclose(qb, qb_ref, atol=ATOL, rtol=RTOL), "stream B mismatch (small)"

    # --- multi-tile case (exercises grid > 1 + batch padding) --------------
    key, ks, ka = jax.random.split(key, 3)
    batch2 = 40
    state2 = jax.random.normal(ks, (batch2, input_dim), jnp.float32)
    action2 = jax.random.normal(ka, (batch2, output_dim), jnp.float32)

    qa2, qb2 = fctqv_forward(state2, action2, w_main, b_main, w_out, b_out, layout)
    jax.block_until_ready((qa2, qb2))
    qa2_ref, qb2_ref = fctqv_forward_ref(state2, action2, params)
    assert qa2.shape == (batch2, 1) and qb2.shape == (batch2, 1)
    assert jnp.allclose(qa2, qa2_ref, atol=ATOL, rtol=RTOL), "stream A mismatch (multi-tile)"
    assert jnp.allclose(qb2, qb2_ref, atol=ATOL, rtol=RTOL), "stream B mismatch (multi-tile)"

    print("KERNEL_OK")
</pallas_src>

<mosaic_0001>
module attributes {stable_mosaic.version = 11 : i64} {
  func.func @kernel(%arg0: i32, %arg1: memref<8x16xbf16, #tpu.memory_space<vmem>>, %arg2: memref<80x64xbf16, #tpu.memory_space<vmem>>, %arg3: memref<2x64xf32, #tpu.memory_space<vmem>>, %arg4: memref<64x128xbf16, #tpu.memory_space<vmem>>, %arg5: memref<1x128xf32, #tpu.memory_space<vmem>>, %arg6: memref<8x128xf32, #tpu.memory_space<vmem>>) attributes {dimension_semantics = [#tpu.dimension_semantics<parallel>], iteration_bounds = array<i64: 1>, scalar_prefetch = 0 : i64, scratch_operands = 0 : i64, tpu.core_type = #tpu.core_type<tc>, window_params = [{transform_indices = @transform_0, window_bounds = array<i64: 8, 16>}, {pipeline_mode = #tpu.pipeline_mode<synchronous>, transform_indices = @transform_1, window_bounds = array<i64: 80, 64>}, {pipeline_mode = #tpu.pipeline_mode<synchronous>, transform_indices = @transform_2, window_bounds = array<i64: 2, 64>}, {pipeline_mode = #tpu.pipeline_mode<synchronous>, transform_indices = @transform_3, window_bounds = array<i64: 64, 128>}, {pipeline_mode = #tpu.pipeline_mode<synchronous>, transform_indices = @transform_4, window_bounds = array<i64: 1, 128>}, {transform_indices = @transform_5, window_bounds = array<i64: 8, 128>}]} {
    %c0 = arith.constant 0 : index
    %c0_0 = arith.constant 0 : index
    %0 = vector.load %arg3[%c0, %c0_0] : memref<2x64xf32, #tpu.memory_space<vmem>>, vector<2x64xf32>
    %c0_1 = arith.constant 0 : index
    %c0_2 = arith.constant 0 : index
    %1 = vector.load %arg2[%c0_1, %c0_2] : memref<80x64xbf16, #tpu.memory_space<vmem>>, vector<16x64xbf16>
    %c0_3 = arith.constant 0 : index
    %c0_4 = arith.constant 0 : index
    %2 = vector.load %arg1[%c0_3, %c0_4] : memref<8x16xbf16, #tpu.memory_space<vmem>>, vector<8x16xbf16>
    %cst = arith.constant dense<0.000000e+00> : vector<8x64xf32>
    %3 = tpu.matmul %2, %1, %cst {dimension_numbers = #tpu.dot_dimension_numbers<[1], [0], [0], [1], [0, 0, 1, 1], [], []>} : vector<8x16xbf16>, vector<16x64xbf16>, vector<8x64xf32> -> vector<8x64xf32>
    %4 = vector.extract_strided_slice %0 {offsets = [0, 0], sizes = [1, 64], strides = [1, 1]} : vector<2x64xf32> to vector<1x64xf32>
    %5 = vector.broadcast %4 : vector<1x64xf32> to vector<8x64xf32>
    %6 = arith.addf %3, %5 : vector<8x64xf32>
    %cst_5 = arith.constant 0.000000e+00 : f32
    %7 = vector.broadcast %cst_5 : f32 to vector<8x64xf32>
    %8 = arith.maximumf %6, %7 : vector<8x64xf32>
    %c16 = arith.constant 16 : index
    %c0_6 = arith.constant 0 : index
    %9 = vector.load %arg2[%c16, %c0_6] : memref<80x64xbf16, #tpu.memory_space<vmem>>, vector<64x64xbf16>
    %10 = arith.truncf %8 : vector<8x64xf32> to vector<8x64xbf16>
    %cst_7 = arith.constant dense<0.000000e+00> : vector<8x64xf32>
    %11 = tpu.matmul %10, %9, %cst_7 {dimension_numbers = #tpu.dot_dimension_numbers<[1], [0], [0], [1], [0, 0, 1, 1], [], []>} : vector<8x64xbf16>, vector<64x64xbf16>, vector<8x64xf32> -> vector<8x64xf32>
    %12 = vector.extract_strided_slice %0 {offsets = [1, 0], sizes = [1, 64], strides = [1, 1]} : vector<2x64xf32> to vector<1x64xf32>
    %13 = vector.broadcast %12 : vector<1x64xf32> to vector<8x64xf32>
    %14 = arith.addf %11, %13 : vector<8x64xf32>
    %cst_8 = arith.constant 0.000000e+00 : f32
    %15 = vector.broadcast %cst_8 : f32 to vector<8x64xf32>
    %16 = arith.maximumf %14, %15 : vector<8x64xf32>
    %17 = arith.truncf %16 : vector<8x64xf32> to vector<8x64xbf16>
    %c0_9 = arith.constant 0 : index
    %c0_10 = arith.constant 0 : index
    %18 = vector.load %arg4[%c0_9, %c0_10] : memref<64x128xbf16, #tpu.memory_space<vmem>>, vector<64x128xbf16>
    %cst_11 = arith.constant dense<0.000000e+00> : vector<8x128xf32>
    %19 = tpu.matmul %17, %18, %cst_11 {dimension_numbers = #tpu.dot_dimension_numbers<[1], [0], [0], [1], [0, 0, 1, 1], [], []>} : vector<8x64xbf16>, vector<64x128xbf16>, vector<8x128xf32> -> vector<8x128xf32>
    %c0_12 = arith.constant 0 : index
    %c0_13 = arith.constant 0 : index
    %20 = vector.load %arg5[%c0_12, %c0_13] : memref<1x128xf32, #tpu.memory_space<vmem>>, vector<1x128xf32>
    %21 = vector.broadcast %20 : vector<1x128xf32> to vector<8x128xf32>
    %22 = arith.addf %19, %21 : vector<8x128xf32>
    %c0_14 = arith.constant 0 : index
    %c0_15 = arith.constant 0 : index
    %23 = vector.load %arg6[%c0_14, %c0_15] : memref<8x128xf32, #tpu.memory_space<vmem>>, vector<8x128xf32>
    tpu.vector_store %arg6[%c0_14, %c0_15], %22 {strides = array<i32>} : memref<8x128xf32, #tpu.memory_space<vmem>>, vector<8x128xf32>,
    return
  }
  func.func @transform_0(%arg0: i32) -> (i32, i32) {
    %c0_i32 = arith.constant 0 : i32
    %c0_i32_0 = arith.constant 0 : i32
    return %arg0, %c0_i32 : i32, i32
  }
  func.func @transform_1(%arg0: i32) -> (i32, i32) {
    %c0_i32 = arith.constant 0 : i32
    %c0_i32_0 = arith.constant 0 : i32
    %c0_i32_1 = arith.constant 0 : i32
    return %c0_i32, %c0_i32_0 : i32, i32
  }
  func.func @transform_2(%arg0: i32) -> (i32, i32) {
    %c0_i32 = arith.constant 0 : i32
    %c0_i32_0 = arith.constant 0 : i32
    %c0_i32_1 = arith.constant 0 : i32
    return %c0_i32, %c0_i32_0 : i32, i32
  }
  func.func @transform_3(%arg0: i32) -> (i32, i32) {
    %c0_i32 = arith.constant 0 : i32
    %c0_i32_0 = arith.constant 0 : i32
    %c0_i32_1 = arith.constant 0 : i32
    return %c0_i32, %c0_i32_0 : i32, i32
  }
  func.func @transform_4(%arg0: i32) -> (i32, i32) {
    %c0_i32 = arith.constant 0 : i32
    %c0_i32_0 = arith.constant 0 : i32
    %c0_i32_1 = arith.constant 0 : i32
    return %c0_i32, %c0_i32_0 : i32, i32
  }
  func.func @transform_5(%arg0: i32) -> (i32, i32) {
    %c0_i32 = arith.constant 0 : i32
    %c0_i32_0 = arith.constant 0 : i32
    return %arg0, %c0_i32 : i32, i32
  }
}

</mosaic_0001>

<bundles_post_ra>
// kernel: tpu_custom_call.1
= control target key start
LH: loop header
LB: loop body
LE: loop exit
PB: predicated region body
PF: predicated region fallthrough
CT: control target
= control target key end

     0   :  { %v350_v1 = vmov 0.0   ;;  %vm351_vm0 = vmmov 0   ;;  %vm36_vm1 = vcmask 130048   ;;  %s424_s0 = inlined_call_operand.vmem [shape: bf16[8,16], index: 0, kind: input, shape index: {}]   ;;  %s425_s1 = inlined_call_operand.vmem [shape: bf16[80,64], index: 1, kind: input, shape index: {}]   ;;  %s426_s2 = inlined_call_operand.vmem [shape: f32[2,64], index: 2, kind: input, shape index: {}]   ;;  %s427_s3 = inlined_call_operand.vmem [shape: bf16[64,128], index: 3, kind: input, shape index: {}]   ;;  %s428_s4 = inlined_call_operand.vmem [shape: f32[1,128], index: 4, kind: input, shape index: {}]   ;;  %s429_s5 = inlined_call_operand.hbm [shape: f32[8,128], index: 5, kind: output, shape index: {}]  }
   0x1   :  { %v319_v0 = vld [vmem:[%s425_s1] sm:$0xff]   ;;  %286 = vmatprep.subr.bf16.mxu0 %v350_v1  ;;  %292 = vmatprep.subr.bf16.mxu1 %v350_v1  ;;  %v321_v4 = vld [vmem:[%s425_s1 + $0x18] sm:$0xff]  }
   0x2   :  { %v25_v2 = vld [vmem:[%s424_s0] sm:$0xf]  ;;  %287 = vmatpush3.bf16.msra.mxu0 %v319_v0  ;;  %288 = vmatprep.mubr.msk.bf16.mxu0 %vm351_vm0, %v350_v1 }
   0x3   :  { %v320_v3 = vld [vmem:[%s425_s1 + $0x20] sm:$0xff]   ;;  %300 = vmatprep.mubr.msk.bf16.mxu1 %vm351_vm0, %v350_v1  ;;  %304 = vmatprep.subr.bf16.mxu0 %v350_v1 }
   0x4   :  { %293 = vmatpush3.bf16.msra.mxu1 %v320_v3 }
   0x5   :  { %289 = vmatmul.mubr.msk.bf16.vlgmr.msra.gmra.mxu0 %vm36_vm1, %v25_v2  ;;  %294 = vmatprep.subr.bf16.mxu1 %v350_v1 }
   0x6   :  { %312 = vmatprep.mubr.msk.bf16.mxu0 %vm351_vm0, %v350_v1 }
   0x8   :  { %295 = vmatpush3.bf16.msra.mxu1 %v321_v4 }
   0x9   :  { %10 = vsyncpa [#allocation3], 0  ;;  %296 = vmatprep.subr.bf16.mxu1 %v350_v1  ;;  %v322_v5 = vld [vmem:[%s425_s1 + $0x10] sm:$0xff]   ;;  %v323_v6 = vld [vmem:[%s425_s1 + $0x8] sm:$0xff]   ;;  %v26_v9 = vlaneseq  ;;  %vm118_vm2 = vcmask 523264   ;;  %s352_s14 = smov [#allocation2]  }
   0xa   :  { %v324_v7 = vld [vmem:[%s427_s3 + $0x18] sm:$0xff]   ;;  %v325_v8 = vld [vmem:[%s427_s3 + $0x10] sm:$0xff]   ;;  %v22_v12 = vld [vmem:[%s426_s2] sm:$0x3]  ;;  %s253_s15 = sshll.u32 %s352_s14, 4  ;;  %s254_s15 = int_to_ptr.vmem [resolvable:$true] %s253_s15 }
   0xb   :  { %305 = vmatpush3.bf16.msra.mxu0 %v324_v7  ;;  %v27_v10 = vshrl.u32 %v26_v9, 7  ;;  %v326_v21 = vld [vmem:[%s427_s3 + $0x8] sm:$0xff]   ;;  %v327_v22 = vld [vmem:[%s427_s3] sm:$0xff]   ;;  %s328_s3 = scalar_lea.vmem %s254_s15, 128  ;;  %p333_p1 = scmp.lt.s32.totalorder %s254_s15, %s254_s15 }
   0xc   :  { %297 = vmatpush3.bf16.msra.mxu1 %v322_v5  ;;  %306 = vmatprep.subr.bf16.mxu0 %v350_v1  ;;  %v268_v32 = vld [vmem:[%s428_s4] ss:$0 sm:$0xff]  ;;  %p329_p0 = scmp.ne.s32.totalorder %s254_s15, %s328_s3  ;;  %p334_p2 = scmp.lt.s32.totalorder %s328_s3, %s328_s3 }
   0xd   :  { %298 = vmatprep.subr.bf16.mxu1 %v350_v1  ;;  %v28_v11 = vsub.s32 0, %v27_v10  ;;  %v92_v23 = vsub.s32 1, %v27_v10 }
   0xe   :  { %p335_p3 = por %p334_p2, %p333_p1 }
   0xf   :  { %307 = vmatpush3.bf16.msra.mxu0 %v325_v8  ;;  %v29_v13 = vrot.slane %v22_v12, %v28_v11  ;;  %v93_v24 = vrot.slane %v22_v12, %v92_v23 }
  0x10   :  { %299 = vmatpush3.bf16.msra.mxu1 %v323_v6  ;;  %308 = vmatprep.subr.bf16.mxu0 %v350_v1  ;;  %p336_p4 = pnand %p335_p3, %p329_p0 }
  0x13   :  { %309 = vmatpush3.bf16.msra.mxu0 %v326_v21 }
  0x14   :  { %310 = vmatprep.subr.bf16.mxu0 %v350_v1 }
  0x17   :  { %311 = vmatpush3.bf16.msra.mxu0 %v327_v22 }
  0xc5   :  { %v74_v14 = vpop.f32.mrf.mxu0 }
  0xc6   :  { %v75_v15 = vadd.f32 %v74_v14, %v29_v13 }
  0xc7   :  { %v290_v16 = vpop.f32.mrf.mxu0 }
  0xc8   :  { %v80_v17 = vmax.f32 %v75_v15, 0.0 }
  0xc9   :  { %v77_v18 = vpop.f32.mrf.mxu0 }
  0xca   :  { %v89_v19 = vpack.c.bf16 %v80_v17, %v80_v17 }
  0xcb   :  { %v291_v20 = vpop.f32.mrf.mxu0 }
  0xcc   :  { %301 = vmatmul.mubr.msk.bf16.vlgmr.msra.gmra.mxu1 %vm118_vm2, %v89_v19 }
 0x18c   :  { %v156_v25 = vpop.f32.mrf.mxu1 }
 0x18d   :  { %v157_v26 = vadd.f32 %v156_v25, %v93_v24 }
 0x18e   :  { %v302_v27 = vpop.f32.mrf.mxu1 }
 0x18f   :  { %v162_v28 = vmax.f32 %v157_v26, 0.0 }
 0x190   :  { %v159_v29 = vpop.f32.mrf.mxu1 }
 0x191   :  { %v163_v30 = vpack.c.bf16 %v162_v28, %v162_v28 }
 0x192   :  { %v303_v31 = vpop.f32.mrf.mxu1 }
 0x193   :  { %313 = vmatmul.mubr.msk.bf16.vlgmr.msra.gmra.mxu0 %vm118_vm2, %v163_v30 }
 0x253   :  { %v240_v33 = vpop.f32.mrf.mxu0 }
 0x254   :  { %v241_v34 = vadd.f32 %v268_v32, %v240_v33 }
 0x255   :  { %v314_v35 = vpop.f32.mrf.mxu0 }
 0x256   :  { %246 = vst [vmem:[#allocation2] sm:$0xff] %v241_v34 }
 0x257   :  { %v243_v36 = vpop.f32.mrf.mxu0 }
 0x258   :  { %339 = shalt.err (!%p336_p4)
}
 0x259   :  { %256 = dma.vmem_to_hbm [thread:$0]  %s254_s15, 128, %s429_s5, [#allocation3]   ;;  %v315_v37 = vpop.f32.mrf.mxu0 }
 0x25a   :  { %348 = dma.done.wait [#allocation3], 128  }
 0x25b   :  { %349 = vsyncadd [#allocation3], 4294967168 }
 0x25c   :  { %260 = vsyncpa [#allocation3], 1 }

</bundles_post_ra>
